<compile_context>
chip_gen: v5e
topology: v5e:2x2
jax: 0.10.0
libtpu: 0.0.40
codegen_flags: <defaults>
</compile_context>

<pallas_src>
import jax
import jax.numpy as jnp
import numpy as np
from jax.experimental import pallas as pl
from jax.experimental.pallas import tpu as pltpu

# Module hyper-parameters (small, consistent with the PyTorch __init__)
OUTPUT_SIZE = 32      # vocab size
EMB = 16              # embedding_size
HID = 32              # hidden_size
NUM_LAYERS = 1        # hidden.repeat(S,1,1) in the attention requires 1 layer
DROPOUT = 0.0         # TODO(synk): stochastic dropout not implemented; p=0 / eval == identity
SEQ = 8               # encoder sequence length
BATCH = 2


def _decoder_kernel(emb_ref, enc_ref, h_ref, c_ref,
                    w_lstm_ref, w_fc_ref, vec_ref,
                    pred_ref, h_out_ref, c_out_ref):
    N, H = h_ref.shape
    SN = enc_ref.shape[0]
    S = SN // N
    V = pred_ref.shape[-1]

    emb = emb_ref[...]                                   # (N, E)
    h = h_ref[...]                                       # (N, H)
    c = c_ref[...]                                       # (N, H)
    enc = enc_ref[...]                                   # (S*N, 2H) 2-D slab

    # packed small vectors (static slices of one (3,128) slab)
    w_e_h = vec_ref[0:1, 0:H]                            # (1, H)   energy weight, hidden part
    w_e_enc = vec_ref[0:1, H:3 * H]                      # (1, 2H)  energy weight, encoder part
    b_e = vec_ref[0:1, 3 * H:3 * H + 1]                  # (1, 1)   energy bias
    b_lstm = vec_ref[1:2, 0:4 * H]                       # (1, 4H)  b_ih + b_hh
    b_fc = vec_ref[2:3, 0:V]                             # (1, V)

    # ---- attention energy: relu(w_h.h + w_enc.enc + b), unrolled over S ----
    e_h = jnp.sum(h * w_e_h, axis=-1, keepdims=True) + b_e          # (N, 1)
    energies = []
    for s in range(S):
        enc_s = enc[s * N:(s + 1) * N, :]                            # (N, 2H)
        e_s = jnp.sum(enc_s * w_e_enc, axis=-1, keepdims=True) + e_h
        energies.append(jnp.maximum(e_s, 0.0))                       # ReLU

    # ---- softmax over the sequence axis + context, unrolled accumulation ----
    m = energies[0]
    for s in range(1, S):
        m = jnp.maximum(m, energies[s])
    exps = [jnp.exp(e - m) for e in energies]                        # each (N, 1)
    denom = exps[0]
    for s in range(1, S):
        denom = denom + exps[s]
    inv = pl.reciprocal(denom, approx=False)                         # (N, 1)
    ctx = exps[0] * enc[0:N, :]
    for s in range(1, S):
        ctx = ctx + exps[s] * enc[s * N:(s + 1) * N, :]
    ctx = ctx * inv                                                  # (N, 2H)

    # ---- single-step LSTM cell: one fused (N,2H+E+H)x(2H+E+H,4H) MXU dot ----
    rnn_x = jnp.concatenate([ctx, emb, h], axis=-1)                  # (N, 112)
    gates = (jnp.dot(rnn_x, w_lstm_ref[...], preferred_element_type=jnp.float32)
             + b_lstm)                                               # (N, 4H), gate order i,f,g,o
    i_g = jax.nn.sigmoid(gates[:, 0 * H:1 * H])
    f_g = jax.nn.sigmoid(gates[:, 1 * H:2 * H])
    g_g = jnp.tanh(gates[:, 2 * H:3 * H])
    o_g = jax.nn.sigmoid(gates[:, 3 * H:4 * H])
    c_new = f_g * c + i_g * g_g
    h_new = o_g * jnp.tanh(c_new)
    c_out_ref[...] = c_new
    h_out_ref[...] = h_new

    # ---- output projection ----
    pred_ref[...] = (jnp.dot(h_new, w_fc_ref[...], preferred_element_type=jnp.float32)
                     + b_fc)


def init_params(key):
    ks = jax.random.split(key, 8)
    def u(k, shape, scale=0.1):
        return jax.random.uniform(k, shape, jnp.float32, -1.0, 1.0) * scale
    return dict(
        embedding=u(ks[0], (OUTPUT_SIZE, EMB), 1.0),            # nn.Embedding(V, E)
        energy_w=u(ks[1], (1, 3 * HID)),                        # nn.Linear(3H, 1).weight
        energy_b=u(ks[2], (1, 1)),                              # nn.Linear(3H, 1).bias
        w_ih=u(ks[3], (4 * HID, 2 * HID + EMB)),                # LSTM weight_ih_l0
        b_ih=u(ks[4], (4 * HID,)),
        w_hh=u(ks[5], (4 * HID, HID)),                          # LSTM weight_hh_l0
        b_hh=u(ks[6], (4 * HID,)),
        fc_w=u(ks[7], (OUTPUT_SIZE, HID)),                      # nn.Linear(H, V)
        fc_b=jnp.zeros((OUTPUT_SIZE,), jnp.float32),
    )


def prepare_params(p):
    """One-time parameter re-layout (hoisted out of the per-step path)."""
    # fused LSTM weight: rows = [ctx(2H) ; emb(E) ; h(H)], cols = 4H gates (i,f,g,o)
    w_lstm = jnp.concatenate([p['w_ih'][:, :2 * HID].T,          # (2H, 4H)
                              p['w_ih'][:, 2 * HID:].T,          # (E,  4H)
                              p['w_hh'].T], axis=0)              # (H,  4H) -> (112, 128)
    # packed small-vector slab, one (8,128)-friendly block
    vec = jnp.zeros((3, 4 * HID), jnp.float32)
    vec = vec.at[0, :HID].set(p['energy_w'][0, :HID])            # energy weight (hidden part)
    vec = vec.at[0, HID:3 * HID].set(p['energy_w'][0, HID:])     # energy weight (encoder part)
    vec = vec.at[0, 3 * HID].set(p['energy_b'][0, 0])            # energy bias
    vec = vec.at[1, :].set(p['b_ih'] + p['b_hh'])                # summed LSTM bias (4H = 128)
    vec = vec.at[2, :OUTPUT_SIZE].set(p['fc_b'])                 # fc bias
    return dict(embedding=p['embedding'],
                w_lstm=w_lstm,                                    # (112, 128)
                w_fc=p['fc_w'].T,                                 # (H, V)
                vec=vec)                                          # (3, 128)


def decoder_forward(src, encoder_states, hidden, cell, prep):
    """src:(N,) int32, encoder_states:(S,N,2H), hidden/cell:(1,N,H) -> (preds, hidden, cell)."""
    S, N, twoH = encoder_states.shape
    emb = prep['embedding'][src]                                 # (N, E); dropout p=0 -> identity
    enc2d = encoder_states.reshape(S * N, twoH)                  # free contiguous view
    h0 = hidden[0]                                               # (N, H)
    c0 = cell[0]                                                 # (N, H)

    vmem = pl.BlockSpec(memory_space=pltpu.MemorySpace.VMEM)
    preds, h_new, c_new = pl.pallas_call(
        _decoder_kernel,
        out_shape=(jax.ShapeDtypeStruct((N, OUTPUT_SIZE), jnp.float32),
                   jax.ShapeDtypeStruct((N, HID), jnp.float32),
                   jax.ShapeDtypeStruct((N, HID), jnp.float32)),
        in_specs=[vmem] * 7,
        out_specs=(vmem, vmem, vmem),
    )(emb, enc2d, h0, c0, prep['w_lstm'], prep['w_fc'], prep['vec'])
    return preds, h_new[None], c_new[None]


def decoder_reference(src, enc, hidden, cell, p):
    """Pure-JAX transcription of the PyTorch forward (eval mode)."""
    emb = p['embedding'][src][None]                              # (1, N, E)
    S = enc.shape[0]
    h_rep = jnp.tile(hidden, (S, 1, 1))                          # (S, N, H)
    cat = jnp.concatenate([h_rep, enc], axis=2)                  # (S, N, 3H)
    energy = jax.nn.relu(cat @ p['energy_w'].T + p['energy_b'][0])   # (S, N, 1)
    attention = jax.nn.softmax(energy, axis=0)                   # (S, N, 1)
    attention_p = jnp.transpose(attention, (1, 2, 0))            # (N, 1, S)
    enc_p = jnp.transpose(enc, (1, 0, 2))                        # (N, S, 2H)
    ctx = jnp.transpose(jnp.matmul(attention_p, enc_p), (1, 0, 2))   # (1, N, 2H)
    rnn_in = jnp.concatenate([ctx, emb], axis=2)[0]              # (N, 2H+E)
    gates = rnn_in @ p['w_ih'].T + p['b_ih'] + hidden[0] @ p['w_hh'].T + p['b_hh']
    H = HID
    i = jax.nn.sigmoid(gates[:, :H]); f = jax.nn.sigmoid(gates[:, H:2 * H])
    g = jnp.tanh(gates[:, 2 * H:3 * H]); o = jax.nn.sigmoid(gates[:, 3 * H:4 * H])
    c_new = f * cell[0] + i * g
    h_new = o * jnp.tanh(c_new)
    preds = h_new @ p['fc_w'].T + p['fc_b']
    return preds, h_new[None], c_new[None]


if __name__ == "__main__":
    key = jax.random.PRNGKey(0)
    kp, k1, k2, k3, k4 = jax.random.split(key, 5)
    params = init_params(kp)
    prep = prepare_params(params)                                # one-time re-layout

    src = jax.random.randint(k1, (BATCH,), 0, OUTPUT_SIZE, dtype=jnp.int32)
    encoder_states = jax.random.normal(k2, (SEQ, BATCH, 2 * HID), jnp.float32)
    hidden = jax.random.normal(k3, (NUM_LAYERS, BATCH, HID), jnp.float32)
    cell = jax.random.normal(k4, (NUM_LAYERS, BATCH, HID), jnp.float32)

    decoder_step = jax.jit(decoder_forward)                      # fuse per-step glue ops
    preds, h_new, c_new = decoder_step(src, encoder_states, hidden, cell, prep)
    jax.block_until_ready((preds, h_new, c_new))

    r_preds, r_h, r_c = decoder_reference(src, encoder_states, hidden, cell, params)
    assert np.allclose(np.asarray(preds), np.asarray(r_preds), rtol=1e-4, atol=1e-4)
    assert np.allclose(np.asarray(h_new), np.asarray(r_h), rtol=1e-4, atol=1e-4)
    assert np.allclose(np.asarray(c_new), np.asarray(r_c), rtol=1e-4, atol=1e-4)
    print("KERNEL_OK")
</pallas_src>

<mosaic_0001>
module attributes {stable_mosaic.version = 11 : i64} {
  func.func @_decoder_kernel(%arg0: memref<2x16xf32, #tpu.memory_space<vmem>>, %arg1: memref<16x64xf32, #tpu.memory_space<vmem>>, %arg2: memref<2x32xf32, #tpu.memory_space<vmem>>, %arg3: memref<2x32xf32, #tpu.memory_space<vmem>>, %arg4: memref<112x128xf32, #tpu.memory_space<vmem>>, %arg5: memref<32x32xf32, #tpu.memory_space<vmem>>, %arg6: memref<3x128xf32, #tpu.memory_space<vmem>>, %arg7: memref<2x32xf32, #tpu.memory_space<vmem>>, %arg8: memref<2x32xf32, #tpu.memory_space<vmem>>, %arg9: memref<2x32xf32, #tpu.memory_space<vmem>>) attributes {dimension_semantics = [], scalar_prefetch = 0 : i64, scratch_operands = 0 : i64, tpu.core_type = #tpu.core_type<tc>} {
    %c0 = arith.constant 0 : index
    %c0_0 = arith.constant 0 : index
    %0 = vector.load %arg0[%c0, %c0_0] : memref<2x16xf32, #tpu.memory_space<vmem>>, vector<2x16xf32>
    %c0_1 = arith.constant 0 : index
    %c0_2 = arith.constant 0 : index
    %1 = vector.load %arg2[%c0_1, %c0_2] : memref<2x32xf32, #tpu.memory_space<vmem>>, vector<2x32xf32>
    %c0_3 = arith.constant 0 : index
    %c0_4 = arith.constant 0 : index
    %2 = vector.load %arg3[%c0_3, %c0_4] : memref<2x32xf32, #tpu.memory_space<vmem>>, vector<2x32xf32>
    %c0_5 = arith.constant 0 : index
    %c0_6 = arith.constant 0 : index
    %3 = vector.load %arg1[%c0_5, %c0_6] : memref<16x64xf32, #tpu.memory_space<vmem>>, vector<16x64xf32>
    %c0_7 = arith.constant 0 : index
    %c0_8 = arith.constant 0 : index
    %4 = vector.load %arg6[%c0_7, %c0_8] : memref<3x128xf32, #tpu.memory_space<vmem>>, vector<1x32xf32>
    %c0_9 = arith.constant 0 : index
    %c32 = arith.constant 32 : index
    %5 = vector.load %arg6[%c0_9, %c32] : memref<3x128xf32, #tpu.memory_space<vmem>>, vector<1x64xf32>
    %c0_10 = arith.constant 0 : index
    %c96 = arith.constant 96 : index
    %6 = vector.load %arg6[%c0_10, %c96] : memref<3x128xf32, #tpu.memory_space<vmem>>, vector<1x1xf32>
    %c1 = arith.constant 1 : index
    %c0_11 = arith.constant 0 : index
    %7 = vector.load %arg6[%c1, %c0_11] : memref<3x128xf32, #tpu.memory_space<vmem>>, vector<1x128xf32>
    %c2 = arith.constant 2 : index
    %c0_12 = arith.constant 0 : index
    %8 = vector.load %arg6[%c2, %c0_12] : memref<3x128xf32, #tpu.memory_space<vmem>>, vector<1x32xf32>
    %9 = vector.broadcast %4 : vector<1x32xf32> to vector<2x32xf32>
    %10 = arith.mulf %1, %9 : vector<2x32xf32>
    %cst = arith.constant dense<0.000000e+00> : vector<2xf32>
    %11 = vector.multi_reduction <add>, %10, %cst [1] : vector<2x32xf32> to vector<2xf32>
    %12 = vector.shape_cast %11 : vector<2xf32> to vector<2x1xf32>
    %13 = vector.broadcast %6 : vector<1x1xf32> to vector<2x1xf32>
    %14 = arith.addf %12, %13 : vector<2x1xf32>
    %15 = vector.extract_strided_slice %3 {offsets = [0, 0], sizes = [2, 64], strides = [1, 1]} : vector<16x64xf32> to vector<2x64xf32>
    %16 = vector.broadcast %5 : vector<1x64xf32> to vector<2x64xf32>
    %17 = arith.mulf %15, %16 : vector<2x64xf32>
    %cst_13 = arith.constant dense<0.000000e+00> : vector<2xf32>
    %18 = vector.multi_reduction <add>, %17, %cst_13 [1] : vector<2x64xf32> to vector<2xf32>
    %19 = vector.shape_cast %18 : vector<2xf32> to vector<2x1xf32>
    %20 = arith.addf %19, %14 : vector<2x1xf32>
    %cst_14 = arith.constant 0.000000e+00 : f32
    %21 = vector.broadcast %cst_14 : f32 to vector<2x1xf32>
    %22 = arith.maximumf %20, %21 : vector<2x1xf32>
    %23 = vector.extract_strided_slice %3 {offsets = [2, 0], sizes = [2, 64], strides = [1, 1]} : vector<16x64xf32> to vector<2x64xf32>
    %24 = vector.broadcast %5 : vector<1x64xf32> to vector<2x64xf32>
    %25 = arith.mulf %23, %24 : vector<2x64xf32>
    %cst_15 = arith.constant dense<0.000000e+00> : vector<2xf32>
    %26 = vector.multi_reduction <add>, %25, %cst_15 [1] : vector<2x64xf32> to vector<2xf32>
    %27 = vector.shape_cast %26 : vector<2xf32> to vector<2x1xf32>
    %28 = arith.addf %27, %14 : vector<2x1xf32>
    %cst_16 = arith.constant 0.000000e+00 : f32
    %29 = vector.broadcast %cst_16 : f32 to vector<2x1xf32>
    %30 = arith.maximumf %28, %29 : vector<2x1xf32>
    %31 = vector.extract_strided_slice %3 {offsets = [4, 0], sizes = [2, 64], strides = [1, 1]} : vector<16x64xf32> to vector<2x64xf32>
    %32 = vector.broadcast %5 : vector<1x64xf32> to vector<2x64xf32>
    %33 = arith.mulf %31, %32 : vector<2x64xf32>
    %cst_17 = arith.constant dense<0.000000e+00> : vector<2xf32>
    %34 = vector.multi_reduction <add>, %33, %cst_17 [1] : vector<2x64xf32> to vector<2xf32>
    %35 = vector.shape_cast %34 : vector<2xf32> to vector<2x1xf32>
    %36 = arith.addf %35, %14 : vector<2x1xf32>
    %cst_18 = arith.constant 0.000000e+00 : f32
    %37 = vector.broadcast %cst_18 : f32 to vector<2x1xf32>
    %38 = arith.maximumf %36, %37 : vector<2x1xf32>
    %39 = vector.extract_strided_slice %3 {offsets = [6, 0], sizes = [2, 64], strides = [1, 1]} : vector<16x64xf32> to vector<2x64xf32>
    %40 = vector.broadcast %5 : vector<1x64xf32> to vector<2x64xf32>
    %41 = arith.mulf %39, %40 : vector<2x64xf32>
    %cst_19 = arith.constant dense<0.000000e+00> : vector<2xf32>
    %42 = vector.multi_reduction <add>, %41, %cst_19 [1] : vector<2x64xf32> to vector<2xf32>
    %43 = vector.shape_cast %42 : vector<2xf32> to vector<2x1xf32>
    %44 = arith.addf %43, %14 : vector<2x1xf32>
    %cst_20 = arith.constant 0.000000e+00 : f32
    %45 = vector.broadcast %cst_20 : f32 to vector<2x1xf32>
    %46 = arith.maximumf %44, %45 : vector<2x1xf32>
    %47 = vector.extract_strided_slice %3 {offsets = [8, 0], sizes = [2, 64], strides = [1, 1]} : vector<16x64xf32> to vector<2x64xf32>
    %48 = vector.broadcast %5 : vector<1x64xf32> to vector<2x64xf32>
    %49 = arith.mulf %47, %48 : vector<2x64xf32>
    %cst_21 = arith.constant dense<0.000000e+00> : vector<2xf32>
    %50 = vector.multi_reduction <add>, %49, %cst_21 [1] : vector<2x64xf32> to vector<2xf32>
    %51 = vector.shape_cast %50 : vector<2xf32> to vector<2x1xf32>
    %52 = arith.addf %51, %14 : vector<2x1xf32>
    %cst_22 = arith.constant 0.000000e+00 : f32
    %53 = vector.broadcast %cst_22 : f32 to vector<2x1xf32>
    %54 = arith.maximumf %52, %53 : vector<2x1xf32>
    %55 = vector.extract_strided_slice %3 {offsets = [10, 0], sizes = [2, 64], strides = [1, 1]} : vector<16x64xf32> to vector<2x64xf32>
    %56 = vector.broadcast %5 : vector<1x64xf32> to vector<2x64xf32>
    %57 = arith.mulf %55, %56 : vector<2x64xf32>
    %cst_23 = arith.constant dense<0.000000e+00> : vector<2xf32>
    %58 = vector.multi_reduction <add>, %57, %cst_23 [1] : vector<2x64xf32> to vector<2xf32>
    %59 = vector.shape_cast %58 : vector<2xf32> to vector<2x1xf32>
    %60 = arith.addf %59, %14 : vector<2x1xf32>
    %cst_24 = arith.constant 0.000000e+00 : f32
    %61 = vector.broadcast %cst_24 : f32 to vector<2x1xf32>
    %62 = arith.maximumf %60, %61 : vector<2x1xf32>
    %63 = vector.extract_strided_slice %3 {offsets = [12, 0], sizes = [2, 64], strides = [1, 1]} : vector<16x64xf32> to vector<2x64xf32>
    %64 = vector.broadcast %5 : vector<1x64xf32> to vector<2x64xf32>
    %65 = arith.mulf %63, %64 : vector<2x64xf32>
    %cst_25 = arith.constant dense<0.000000e+00> : vector<2xf32>
    %66 = vector.multi_reduction <add>, %65, %cst_25 [1] : vector<2x64xf32> to vector<2xf32>
    %67 = vector.shape_cast %66 : vector<2xf32> to vector<2x1xf32>
    %68 = arith.addf %67, %14 : vector<2x1xf32>
    %cst_26 = arith.constant 0.000000e+00 : f32
    %69 = vector.broadcast %cst_26 : f32 to vector<2x1xf32>
    %70 = arith.maximumf %68, %69 : vector<2x1xf32>
    %71 = vector.extract_strided_slice %3 {offsets = [14, 0], sizes = [2, 64], strides = [1, 1]} : vector<16x64xf32> to vector<2x64xf32>
    %72 = vector.broadcast %5 : vector<1x64xf32> to vector<2x64xf32>
    %73 = arith.mulf %71, %72 : vector<2x64xf32>
    %cst_27 = arith.constant dense<0.000000e+00> : vector<2xf32>
    %74 = vector.multi_reduction <add>, %73, %cst_27 [1] : vector<2x64xf32> to vector<2xf32>
    %75 = vector.shape_cast %74 : vector<2xf32> to vector<2x1xf32>
    %76 = arith.addf %75, %14 : vector<2x1xf32>
    %cst_28 = arith.constant 0.000000e+00 : f32
    %77 = vector.broadcast %cst_28 : f32 to vector<2x1xf32>
    %78 = arith.maximumf %76, %77 : vector<2x1xf32>
    %79 = arith.maximumf %22, %30 : vector<2x1xf32>
    %80 = arith.maximumf %79, %38 : vector<2x1xf32>
    %81 = arith.maximumf %80, %46 : vector<2x1xf32>
    %82 = arith.maximumf %81, %54 : vector<2x1xf32>
    %83 = arith.maximumf %82, %62 : vector<2x1xf32>
    %84 = arith.maximumf %83, %70 : vector<2x1xf32>
    %85 = arith.maximumf %84, %78 : vector<2x1xf32>
    %86 = arith.subf %22, %85 : vector<2x1xf32>
    %87 = math.exp %86 : vector<2x1xf32>
    %88 = arith.subf %30, %85 : vector<2x1xf32>
    %89 = math.exp %88 : vector<2x1xf32>
    %90 = arith.subf %38, %85 : vector<2x1xf32>
    %91 = math.exp %90 : vector<2x1xf32>
    %92 = arith.subf %46, %85 : vector<2x1xf32>
    %93 = math.exp %92 : vector<2x1xf32>
    %94 = arith.subf %54, %85 : vector<2x1xf32>
    %95 = math.exp %94 : vector<2x1xf32>
    %96 = arith.subf %62, %85 : vector<2x1xf32>
    %97 = math.exp %96 : vector<2x1xf32>
    %98 = arith.subf %70, %85 : vector<2x1xf32>
    %99 = math.exp %98 : vector<2x1xf32>
    %100 = arith.subf %78, %85 : vector<2x1xf32>
    %101 = math.exp %100 : vector<2x1xf32>
    %102 = arith.addf %87, %89 : vector<2x1xf32>
    %103 = arith.addf %102, %91 : vector<2x1xf32>
    %104 = arith.addf %103, %93 : vector<2x1xf32>
    %105 = arith.addf %104, %95 : vector<2x1xf32>
    %106 = arith.addf %105, %97 : vector<2x1xf32>
    %107 = arith.addf %106, %99 : vector<2x1xf32>
    %108 = arith.addf %107, %101 : vector<2x1xf32>
    %109 = tpu.reciprocal %108 : vector<2x1xf32> -> vector<2x1xf32>
    %110 = vector.extract_strided_slice %3 {offsets = [0, 0], sizes = [2, 64], strides = [1, 1]} : vector<16x64xf32> to vector<2x64xf32>
    %111 = vector.broadcast %87 : vector<2x1xf32> to vector<2x64xf32>
    %112 = arith.mulf %111, %110 : vector<2x64xf32>
    %113 = vector.extract_strided_slice %3 {offsets = [2, 0], sizes = [2, 64], strides = [1, 1]} : vector<16x64xf32> to vector<2x64xf32>
    %114 = vector.broadcast %89 : vector<2x1xf32> to vector<2x64xf32>
    %115 = arith.mulf %114, %113 : vector<2x64xf32>
    %116 = arith.addf %112, %115 : vector<2x64xf32>
    %117 = vector.extract_strided_slice %3 {offsets = [4, 0], sizes = [2, 64], strides = [1, 1]} : vector<16x64xf32> to vector<2x64xf32>
    %118 = vector.broadcast %91 : vector<2x1xf32> to vector<2x64xf32>
    %119 = arith.mulf %118, %117 : vector<2x64xf32>
    %120 = arith.addf %116, %119 : vector<2x64xf32>
    %121 = vector.extract_strided_slice %3 {offsets = [6, 0], sizes = [2, 64], strides = [1, 1]} : vector<16x64xf32> to vector<2x64xf32>
    %122 = vector.broadcast %93 : vector<2x1xf32> to vector<2x64xf32>
    %123 = arith.mulf %122, %121 : vector<2x64xf32>
    %124 = arith.addf %120, %123 : vector<2x64xf32>
    %125 = vector.extract_strided_slice %3 {offsets = [8, 0], sizes = [2, 64], strides = [1, 1]} : vector<16x64xf32> to vector<2x64xf32>
    %126 = vector.broadcast %95 : vector<2x1xf32> to vector<2x64xf32>
    %127 = arith.mulf %126, %125 : vector<2x64xf32>
    %128 = arith.addf %124, %127 : vector<2x64xf32>
    %129 = vector.extract_strided_slice %3 {offsets = [10, 0], sizes = [2, 64], strides = [1, 1]} : vector<16x64xf32> to vector<2x64xf32>
    %130 = vector.broadcast %97 : vector<2x1xf32> to vector<2x64xf32>
    %131 = arith.mulf %130, %129 : vector<2x64xf32>
    %132 = arith.addf %128, %131 : vector<2x64xf32>
    %133 = vector.extract_strided_slice %3 {offsets = [12, 0], sizes = [2, 64], strides = [1, 1]} : vector<16x64xf32> to vector<2x64xf32>
    %134 = vector.broadcast %99 : vector<2x1xf32> to vector<2x64xf32>
    %135 = arith.mulf %134, %133 : vector<2x64xf32>
    %136 = arith.addf %132, %135 : vector<2x64xf32>
    %137 = vector.extract_strided_slice %3 {offsets = [14, 0], sizes = [2, 64], strides = [1, 1]} : vector<16x64xf32> to vector<2x64xf32>
    %138 = vector.broadcast %101 : vector<2x1xf32> to vector<2x64xf32>
    %139 = arith.mulf %138, %137 : vector<2x64xf32>
    %140 = arith.addf %136, %139 : vector<2x64xf32>
    %141 = vector.broadcast %109 : vector<2x1xf32> to vector<2x64xf32>
    %142 = arith.mulf %140, %141 : vector<2x64xf32>
    %143 = tpu.concatenate %142, %0, %1 in 1 : vector<2x64xf32>, vector<2x16xf32>, vector<2x32xf32> -> vector<2x112xf32>
    %c0_29 = arith.constant 0 : index
    %c0_30 = arith.constant 0 : index
    %144 = vector.load %arg4[%c0_29, %c0_30] : memref<112x128xf32, #tpu.memory_space<vmem>>, vector<112x128xf32>
    %cst_31 = arith.constant dense<0.000000e+00> : vector<2x128xf32>
    %145 = tpu.matmul %143, %144, %cst_31 {dimension_numbers = #tpu.dot_dimension_numbers<[1], [0], [0], [1], [0, 0, 1, 1], [], []>} : vector<2x112xf32>, vector<112x128xf32>, vector<2x128xf32> -> vector<2x128xf32>
    %146 = vector.broadcast %7 : vector<1x128xf32> to vector<2x128xf32>
    %147 = arith.addf %145, %146 : vector<2x128xf32>
    %148 = vector.extract_strided_slice %147 {offsets = [0, 0], sizes = [2, 32], strides = [1, 1]} : vector<2x128xf32> to vector<2x32xf32>
    %149 = arith.negf %148 : vector<2x32xf32>
    %150 = math.exp %149 : vector<2x32xf32>
    %cst_32 = arith.constant 1.000000e+00 : f32
    %151 = vector.broadcast %cst_32 : f32 to vector<2x32xf32>
    %152 = arith.addf %151, %150 : vector<2x32xf32>
    %153 = arith.divf %151, %152 : vector<2x32xf32>
    %154 = vector.extract_strided_slice %147 {offsets = [0, 32], sizes = [2, 32], strides = [1, 1]} : vector<2x128xf32> to vector<2x32xf32>
    %155 = arith.negf %154 : vector<2x32xf32>
    %156 = math.exp %155 : vector<2x32xf32>
    %cst_33 = arith.constant 1.000000e+00 : f32
    %157 = vector.broadcast %cst_33 : f32 to vector<2x32xf32>
    %158 = arith.addf %157, %156 : vector<2x32xf32>
    %159 = arith.divf %157, %158 : vector<2x32xf32>
    %160 = vector.extract_strided_slice %147 {offsets = [0, 64], sizes = [2, 32], strides = [1, 1]} : vector<2x128xf32> to vector<2x32xf32>
    %161 = math.tanh %160 : vector<2x32xf32>
    %162 = vector.extract_strided_slice %147 {offsets = [0, 96], sizes = [2, 32], strides = [1, 1]} : vector<2x128xf32> to vector<2x32xf32>
    %163 = arith.negf %162 : vector<2x32xf32>
    %164 = math.exp %163 : vector<2x32xf32>
    %cst_34 = arith.constant 1.000000e+00 : f32
    %165 = vector.broadcast %cst_34 : f32 to vector<2x32xf32>
    %166 = arith.addf %165, %164 : vector<2x32xf32>
    %167 = arith.divf %165, %166 : vector<2x32xf32>
    %168 = arith.mulf %159, %2 : vector<2x32xf32>
    %169 = arith.mulf %153, %161 : vector<2x32xf32>
    %170 = arith.addf %168, %169 : vector<2x32xf32>
    %171 = math.tanh %170 : vector<2x32xf32>
    %172 = arith.mulf %167, %171 : vector<2x32xf32>
    %c0_35 = arith.constant 0 : index
    %c0_36 = arith.constant 0 : index
    %173 = vector.load %arg9[%c0_35, %c0_36] : memref<2x32xf32, #tpu.memory_space<vmem>>, vector<2x32xf32>
    tpu.vector_store %arg9[%c0_35, %c0_36], %170 {strides = array<i32>} : memref<2x32xf32, #tpu.memory_space<vmem>>, vector<2x32xf32>,
    %c0_37 = arith.constant 0 : index
    %c0_38 = arith.constant 0 : index
    %174 = vector.load %arg8[%c0_37, %c0_38] : memref<2x32xf32, #tpu.memory_space<vmem>>, vector<2x32xf32>
    tpu.vector_store %arg8[%c0_37, %c0_38], %172 {strides = array<i32>} : memref<2x32xf32, #tpu.memory_space<vmem>>, vector<2x32xf32>,
    %c0_39 = arith.constant 0 : index
    %c0_40 = arith.constant 0 : index
    %175 = vector.load %arg5[%c0_39, %c0_40] : memref<32x32xf32, #tpu.memory_space<vmem>>, vector<32x32xf32>
    %cst_41 = arith.constant dense<0.000000e+00> : vector<2x32xf32>
    %176 = tpu.matmul %172, %175, %cst_41 {dimension_numbers = #tpu.dot_dimension_numbers<[1], [0], [0], [1], [0, 0, 1, 1], [], []>} : vector<2x32xf32>, vector<32x32xf32>, vector<2x32xf32> -> vector<2x32xf32>
    %177 = vector.broadcast %8 : vector<1x32xf32> to vector<2x32xf32>
    %178 = arith.addf %176, %177 : vector<2x32xf32>
    %c0_42 = arith.constant 0 : index
    %c0_43 = arith.constant 0 : index
    %179 = vector.load %arg7[%c0_42, %c0_43] : memref<2x32xf32, #tpu.memory_space<vmem>>, vector<2x32xf32>
    tpu.vector_store %arg7[%c0_42, %c0_43], %178 {strides = array<i32>} : memref<2x32xf32, #tpu.memory_space<vmem>>, vector<2x32xf32>,
    return
  }
}

</mosaic_0001>

<bundles_post_ra>
// kernel: decoder_forward.1
= control target key start
LH: loop header
LB: loop body
LE: loop exit
PB: predicated region body
PF: predicated region fallthrough
CT: control target
= control target key end

     0   :  { %15 = vsyncpa [#allocation3], 0  ;;  %s835_s0 = inlined_call_operand.vmem [shape: f32[2,16], index: 0, kind: input, shape index: {}]   ;;  %s836_s1 = inlined_call_operand.vmem [shape: f32[16,64], index: 1, kind: input, shape index: {}]   ;;  %s837_s2 = inlined_call_operand.vmem [shape: f32[2,32], index: 2, kind: input, shape index: {}]   ;;  %s838_s3 = inlined_call_operand.vmem [shape: f32[2,32], index: 3, kind: input, shape index: {}]   ;;  %s839_s4 = inlined_call_operand.hbm [shape: f32[112,128], index: 4, kind: input, shape index: {}]   ;;  %s840_s5 = inlined_call_operand.vmem [shape: f32[32,32], index: 5, kind: input, shape index: {}]   ;;  %s841_s6 = inlined_call_operand.vmem [shape: f32[3,128], index: 6, kind: input, shape index: {}]   ;;  %s842_s7 = inlined_call_operand.hbm [shape: f32[2,32], index: 7, kind: output, shape index: {0}]   ;;  %s843_s8 = inlined_call_operand.hbm [shape: f32[2,32], index: 8, kind: output, shape index: {1}]   ;;  %s844_s9 = inlined_call_operand.hbm [shape: f32[2,32], index: 9, kind: output, shape index: {2}]  }
   0x1   :  { %16 = vsyncpa [#allocation4], 0 }
   0x2   :  { %17 = vsyncpa [#allocation7], 0  ;;  %s30_s11 = sshll.u32 %s839_s4, 4  ;;  %s656_s12 = smov [#allocation2]   ;;  %s31_s11 = int_to_ptr.hbm [resolvable:$true] %s30_s11 }
   0x3   :  { %s32_s13 = sshll.u32 %s656_s12, 4  ;;  %s657_s14 = smov 128   ;;  %s33_s13 = int_to_ptr.vmem [resolvable:$true] %s32_s13 }
   0x4   :  { %s658_s15 = smov 8  }
   0x5   :  { %38 = dma.hbm_to_vmem [thread:$0]  %s31_s11, 1792, %s33_s13, [#allocation3], %s657_s14, %s657_s14, %s658_s15  }
   0x6   :  { %650 = dma.done.wait [#allocation3], 1792  }
   0x7   :  { %651 = vsyncadd [#allocation3], 4294965504  ;;  %v724_v0 = vld [vmem:[%s837_s2] sm:$0x3]  ;;  %vm57_vm0 = vcmask 254976   ;;  %s659_s4 = smov 96  }
   0x8   :  { %v525_v1 = vld [vmem:[%s841_s6] ss:$0 sm:$0xff]  ;;  %vm94_vm1 = vcmask 523270   ;;  %vm84_vm2 = vcmask 521220   ;;  %vm73_vm3 = vcmask 519170   ;;  %v741_v11 = vld [vmem:[%s836_s1 + $0x8] sm:$0xff] }
   0x9   :  { %v56_v2 = vmul.f32 %v525_v1, %v724_v0  ;;  %v735_v5 = vld [vmem:[%s836_s1] sm:$0xff]  ;;  %s660_s23 = smov 32   ;;  %vm67_vm4 = vcmask 517120   ;;  %s663_s25 = smov 64   ;;  %vm331_vm9 = vcmask 523264   ;;  %vm333_vm10 = vcmask 654336  }
   0xa   :  { %vm350_vm11 = vcmask 916480   ;;  %s665_s16 = smov [#allocation6]   ;;  %s483_s22 = sshll.u32 %s844_s9, 4  ;;  %s484_s22 = int_to_ptr.hbm [resolvable:$true] %s483_s22 }
   0xb   :  { %v58_v3 = vsel %vm57_vm0, %v56_v2, 0.0  ;;  %s470_s17 = sshll.u32 %s665_s16, 4  ;;  %s461_s26 = sshll.u32 %s842_s7, 4  ;;  %s471_s17 = int_to_ptr.vmem [resolvable:$true] %s470_s17  ;;  %s462_s26 = int_to_ptr.hbm [resolvable:$true] %s461_s26 }
   0xc   :  { %59 = vadd.xlane.f32.xlu0 %v58_v3 }
  0x20   :  { %63 = vrot.lane.b32.xlu0 %v525_v1, %s659_s4 }
  0x7f   :  { %v60_v4 = vpop.xlane.xlu0 %59 }
  0x80   :  { %v61_v16 = vadd.f32 %v525_v1, %v60_v4 }
  0x82   :  { %v88_v17 = vrot.slane %v61_v16, 4  ;;  %v78_v18 = vrot.slane %v61_v16, 6  ;;  %v98_v19 = vrot.slane %v61_v16, 2 }
  0x92   :  { %v64_v6 = vpop.permute.xlu0 %63 }
  0x93   :  { %v66_v7 = vmul.f32 %v64_v6, %v735_v5  ;;  %v104_v12 = vmul.f32 %v64_v6, %v741_v11 }
  0x95   :  { %v95_v8 = vsel %vm94_vm1, %v66_v7, 0.0  ;;  %v85_v9 = vsel %vm84_vm2, %v66_v7, 0.0  ;;  %v74_v10 = vsel %vm73_vm3, %v66_v7, 0.0  ;;  %v120_v13 = vsel %vm94_vm1, %v104_v12, 0.0 }
  0x96   :  { %96 = vadd.xlane.f32.xlu0 %v95_v8  ;;  %86 = vadd.xlane.f32.xlu2 %v85_v9  ;;  %v115_v14 = vsel %vm84_vm2, %v104_v12, 0.0  ;;  %v110_v15 = vsel %vm73_vm3, %v104_v12, 0.0  ;;  %v68_v20 = vsel %vm67_vm4, %v66_v7, 0.0  ;;  %v105_v21 = vsel %vm67_vm4, %v104_v12, 0.0 }
  0x97   :  { %75 = vadd.xlane.f32.xlu1 %v74_v10  ;;  %v661_v12 = vmov 0   ;;  %vm430_vm1 = vcmask 261120  }
  0x98   :  { %517 = vset.pattern.permute.xlu2 %v661_v12  ;;  %519 = vset.pattern.permute.xlu1 %v661_v12 }
  0x9e   :  { %121 = vadd.xlane.f32.xlu0 %v120_v13  ;;  %116 = vadd.xlane.f32.xlu2 %v115_v14 }
  0x9f   :  { %111 = vadd.xlane.f32.xlu1 %v110_v15 }
  0xb6   :  { %89 = vrot.lane.b32.xlu2 %v88_v17, %s660_s23 }
  0xb8   :  { %79 = vrot.lane.b32.xlu1 %v78_v18, %s660_s23 }
  0xbe   :  { %99 = vrot.lane.b32.xlu2 %v98_v19, %s660_s23 }
  0xe2   :  { %69 = vadd.xlane.f32.xlu1 %v68_v20  ;;  %v662_v20 = vmov 96  }
  0xe3   :  { %518 = vset.pattern.permute.xlu0 %v662_v20 }
  0xe7   :  { %106 = vadd.xlane.f32.xlu2 %v105_v21 }
 0x109   :  { %v87_v22 = vpop.xlane.xlu2 %86  ;;  %v97_v24 = vpop.xlane.xlu0 %96 }
 0x10a   :  { %v76_v25 = vpop.xlane.xlu1 %75 }
 0x111   :  { %v117_v23 = vpop.xlane.xlu2 %116  ;;  %v122_v30 = vpop.xlane.xlu0 %121 }
 0x112   :  { %v112_v32 = vpop.xlane.xlu1 %111 }
 0x119   :  { %v90_v26 = vpop.permute.xlu2 %89 }
 0x11a   :  { %v747_v27 = vadd.f32 %v90_v26, %v87_v22  ;;  %v118_v45 = vadd.f32 %v117_v23, %v90_v26 }
 0x11c   :  { %v93_v28 = vmax.f32 %v747_v27, 0.0  ;;  %v119_v47 = vmax.f32 %v118_v45, 0.0  ;;  %v47_v45 = vld [vmem:[%s835_s0] sm:$0x3]  ;;  %s664_s0 = smov 80  }
 0x11e   :  { %v132_v29 = vrot.slane %v93_v28, 4  ;;  %v151_v48 = vrot.slane %v119_v47, 4 }
 0x120   :  { %133 = vrot.lane.b32.xlu1 %v132_v29, %s659_s4 }
 0x121   :  { %v100_v31 = vpop.permute.xlu2 %99 }
 0x122   :  { %v753_v33 = vadd.f32 %v100_v31, %v97_v24  ;;  %v755_v34 = vadd.f32 %v122_v30, %v100_v31 }
 0x124   :  { %v103_v35 = vmax.f32 %v753_v33, 0.0  ;;  %v124_v36 = vmax.f32 %v755_v34, 0.0 }
 0x126   :  { %v138_v37 = vrot.slane %v103_v35, 6  ;;  %v157_v38 = vrot.slane %v124_v36, 6 }
 0x128   :  { %139 = vrot.lane.b32.xlu2 %v138_v37, %s659_s4  ;;  %158 = vrot.lane.b32.xlu1 %v157_v38, %s659_s4 }
 0x12a   :  { %v80_v39 = vpop.permute.xlu1 %79 }
 0x12b   :  { %v82_v40 = vadd.f32 %v80_v39, %v76_v25  ;;  %v113_v42 = vadd.f32 %v112_v32, %v80_v39 }
 0x12d   :  { %v83_v41 = vmax.f32 %v82_v40, 0.0  ;;  %v114_v44 = vmax.f32 %v113_v42, 0.0 }
 0x12f   :  { %v126_v43 = vrot.slane %v83_v41, 2  ;;  %v145_v46 = vrot.slane %v114_v44, 2 }
 0x131   :  { %127 = vrot.lane.b32.xlu0 %v126_v43, %s659_s4 }
 0x139   :  { %146 = vrot.lane.b32.xlu0 %v145_v46, %s659_s4 }
 0x141   :  { %152 = vrot.lane.b32.xlu0 %v151_v48, %s659_s4 }
 0x155   :  { %v70_v49 = vpop.xlane.xlu1 %69 }
 0x156   :  { %v71_v50 = vadd.f32 %v70_v49, %v61_v16 }
 0x158   :  { %v72_v52 = vmax.f32 %v71_v50, 0.0 }
 0x15a   :  { %v107_v51 = vpop.xlane.xlu2 %106 }
 0x15b   :  { %v108_v57 = vadd.f32 %v107_v51, %v61_v16 }
 0x15d   :  { %v109_v61 = vmax.f32 %v108_v57, 0.0 }
 0x182   :  { %v140_v58 = vpop.permute.xlu2 %139 }
 0x192   :  { %v134_v55 = vpop.permute.xlu1 %133 }
 0x19a   :  { %v159_v3 = vpop.permute.xlu1 %158 }
 0x1a3   :  { %v128_v53 = vpop.permute.xlu0 %127 }
 0x1a4   :  { %v130_v54 = vmax.f32 %v72_v52, %v128_v53 }
 0x1a6   :  { %v136_v56 = vmax.f32 %v130_v54, %v134_v55  ;;  %v348_v54 = vld [vmem:[#allocation2 + $0x68] sm:$0xff]  ;;  %v347_v55 = vld [vmem:[#allocation2 + $0x60] sm:$0xff] }
 0x1a7   :  { %356 = vmatpush.msra.mxu0 %v348_v54 }
 0x1a8   :  { %v142_v59 = vmax.f32 %v136_v56, %v140_v58  ;;  %v346_v58 = vld [vmem:[#allocation2 + $0x58] sm:$0xff] }
 0x1a9   :  { %357 = vmatpush.msra.mxu0 %v347_v55 }
 0x1aa   :  { %v143_v62 = vmax.f32 %v142_v59, %v109_v61 }
 0x1ab   :  { %v147_v60 = vpop.permute.xlu0 %146  ;;  %358 = vmatpush.msra.mxu0 %v346_v58 }
 0x1ac   :  { %v149_v63 = vmax.f32 %v143_v62, %v147_v60 }
 0x1b3   :  { %v153_v1 = vpop.permute.xlu0 %152 }
 0x1b4   :  { %v155_v2 = vmax.f32 %v149_v63, %v153_v1  ;;  %v344_v63 = vld [vmem:[#allocation2 + $0x48] sm:$0xff]  ;;  %v343_v1 = vld [vmem:[#allocation2 + $0x40] sm:$0xff] }
 0x1b6   :  { %v161_v4 = vmax.f32 %v155_v2, %v159_v3  ;;  %v342_v2 = vld [vmem:[#allocation2 + $0x38] sm:$0xff]  ;;  %v341_v3 = vld [vmem:[#allocation2 + $0x30] sm:$0xff] }
 0x1b8   :  { %v162_v6 = vsub.f32 %v72_v52, %v161_v4  ;;  %v187_v7 = vsub.f32 %v109_v61, %v161_v4  ;;  %v180_v8 = vrot.slane %v161_v4, 2  ;;  %v173_v9 = vrot.slane %v161_v4, 4  ;;  %v345_v61 = vld [vmem:[#allocation2 + $0x50] sm:$0xff] }
 0x1b9   :  { %v166_v10 = vrot.slane %v161_v4, 6  ;;  %359 = vmatpush.msra.mxu0 %v345_v61 }
 0x1ba   :  { %181 = vrot.lane.b32.xlu1 %v180_v8, %s660_s23  ;;  %174 = vrot.lane.b32.xlu0 %v173_v9, %s660_s23  ;;  %v188_v42 = vmul.f32 1.442695, %v187_v7  ;;  %v340_v7 = vld [vmem:[#allocation2 + $0x28] sm:$0xff] }
 0x1bb   :  { %167 = vrot.lane.b32.xlu2 %v166_v10, %s660_s23  ;;  %360 = vmatpush.msra.mxu0 %v344_v63 }
 0x1bd   :  { %361 = vmatpush.msra.mxu0 %v343_v1 }
 0x1bf   :  { %362 = vmatpush.msra.mxu0 %v342_v2 }
 0x1c1   :  { %363 = vmatpush.msra.mxu0 %v341_v3 }
 0x1c3   :  { %364 = vmatpush.msra.mxu0 %v340_v7 }
 0x215   :  { %v168_v13 = vpop.permute.xlu2 %167 }
 0x216   :  { %v170_v14 = vsub.f32 %v83_v41, %v168_v13  ;;  %v190_v16 = vsub.f32 %v114_v44, %v168_v13 }
 0x218   :  { %v171_v15 = vmul.f32 1.442695, %v170_v14  ;;  %v191_v17 = vmul.f32 1.442695, %v190_v16 }
 0x21a   :  { %528 = vpow2.f32 %v171_v15 }
 0x21b   :  { %530 = vpow2.f32 %v191_v17 }
 0x220   :  { %v529_v18 = vpop.eup %528 }
 0x221   :  { %v200_v19 = vrot.slane %v529_v18, 2  ;;  %v531_v21 = vpop.eup %530 }
 0x222   :  { %v219_v22 = vrot.slane %v531_v21, 2 }
 0x223   :  { %201 = vrot.lane.b32.xlu2 %v200_v19, %s659_s4 }
 0x22b   :  { %220 = vrot.lane.b32.xlu2 %v219_v22, %s659_s4  ;;  %v336_v22 = vld [vmem:[#allocation2 + $0x8] sm:$0xff] }
 0x22c   :  { %v182_v23 = vpop.permute.xlu1 %181  ;;  %v175_v24 = vpop.permute.xlu0 %174 }
 0x22d   :  { %v184_v25 = vsub.f32 %v103_v35, %v182_v23  ;;  %v177_v26 = vsub.f32 %v93_v28, %v175_v24  ;;  %v196_v30 = vsub.f32 %v124_v36, %v182_v23  ;;  %v193_v32 = vsub.f32 %v119_v47, %v175_v24 }
 0x22e   :  { %v163_v35 = vmul.f32 1.442695, %v162_v6 }
 0x22f   :  { %v185_v29 = vmul.f32 1.442695, %v184_v25  ;;  %v178_v31 = vmul.f32 1.442695, %v177_v26  ;;  %v197_v37 = vmul.f32 1.442695, %v196_v30 }
 0x230   :  { %v194_v38 = vmul.f32 1.442695, %v193_v32  ;;  %v335_v25 = vld [vmem:[#allocation2] sm:$0xff] }
 0x231   :  { %532 = vpow2.f32 %v185_v29 }
 0x232   :  { %534 = vpow2.f32 %v178_v31 }
 0x233   :  { %257 = vperm.xlu2 %517, %v529_v18   ;;  %536 = vpow2.f32 %v197_v37  ;;  %v339_v18 = vld [vmem:[#allocation2 + $0x20] sm:$0xff] }
 0x234   :  { %538 = vpow2.f32 %v194_v38  ;;  %365 = vmatpush.msra.mxu0 %v339_v18 }
 0x235   :  { %540 = vpow2.f32 %v163_v35 }
 0x236   :  { %542 = vpow2.f32 %v188_v42 }
 0x237   :  { %v533_v39 = vpop.eup %532 }
 0x238   :  { %v212_v40 = vrot.slane %v533_v39, 6  ;;  %v535_v41 = vpop.eup %534 }
 0x239   :  { %v206_v27 = vrot.slane %v535_v41, 4  ;;  %v537_v28 = vpop.eup %536 }
 0x23a   :  { %213 = vrot.lane.b32.xlu1 %v212_v40, %s659_s4  ;;  %v539_v33 = vpop.eup %538  ;;  %v231_v34 = vrot.slane %v537_v28, 6 }
 0x23b   :  { %275 = vperm.xlu2 %517, %v533_v39   ;;  %207 = vrot.lane.b32.xlu0 %v206_v27, %s659_s4  ;;  %v225_v36 = vrot.slane %v539_v33, 4  ;;  %v541_v43 = vpop.eup %540 }
 0x23c   :  { %v543_v44 = vpop.eup %542 }
 0x242   :  { %232 = vrot.lane.b32.xlu1 %v231_v34, %s659_s4 }
 0x243   :  { %291 = vperm.xlu2 %517, %v531_v21   ;;  %226 = vrot.lane.b32.xlu0 %v225_v36, %s659_s4  ;;  %v337_v21 = vld [vmem:[#allocation2 + $0x10] sm:$0xff] }
 0x24a   :  { %266 = vperm.xlu1 %519, %v535_v41  }
 0x24b   :  { %523 = vset.pattern.permute.xlu2 %v662_v20  ;;  %252 = vperm.xlu0 %518, %v541_v43  }
 0x252   :  { %520 = vset.pattern.permute.xlu1 %v662_v20 }
 0x253   :  { %285 = vperm.xlu1 %520, %v543_v44   ;;  %521 = vset.pattern.permute.xlu0 %v661_v12 }
 0x254   :  { %300 = vperm.xlu0 %521, %v539_v33  }
 0x25b   :  { %522 = vset.pattern.permute.xlu1 %v661_v12 }
 0x25c   :  { %309 = vperm.xlu1 %522, %v537_v28   ;;  %524 = vset.pattern.permute.xlu0 %v662_v20  ;;  %v338_v20 = vld [vmem:[#allocation2 + $0x18] sm:$0xff] }
 0x25d   :  { %366 = vmatpush.msra.mxu0 %v338_v20  ;;  %v427_v20 = vld [vmem:[%s840_s5 + $0x10] sm:$0xff] }
 0x25f   :  { %367 = vmatpush.msra.mxu0 %v337_v21  ;;  %v426_v21 = vld [vmem:[%s840_s5 + $0x8] sm:$0xff] }
 0x261   :  { %368 = vmatpush.msra.mxu0 %v336_v22  ;;  %v425_v22 = vld [vmem:[%s840_s5] sm:$0xff] }
 0x263   :  { %369 = vmatpush.msra.mxu0 %v335_v25 }
 0x264   :  { %324 = vrot.lane.b32.xlu1 %v47_v45, %s663_s25 }
 0x27d   :  { %v202_v46 = vpop.permute.xlu2 %201 }
 0x27e   :  { %v204_v47 = vadd.f32 %v541_v43, %v202_v46 }
 0x285   :  { %v221_v53 = vpop.permute.xlu2 %220 }
 0x28d   :  { %v258_v17 = vpop.permute.xlu2 %257 }
 0x28e   :  { %v260_v24 = vmul.f32 %v258_v17, %v735_v5 }
 0x290   :  { %v262_v31 = vrot.slane %v260_v24, 2 }
 0x295   :  { %v276_v26 = vpop.permute.xlu2 %275 }
 0x296   :  { %v278_v39 = vmul.f32 %v276_v26, %v735_v5  ;;  %v527_v26 = vld [vmem:[%s841_s6 + $0x2] ss:$0 sm:$0xff] }
 0x298   :  { %v280_v27 = vrot.slane %v278_v39, 6 }
 0x29d   :  { %v292_v41 = vpop.permute.xlu2 %291 }
 0x29e   :  { %v294_v33 = vmul.f32 %v292_v41, %v741_v11 }
 0x2a0   :  { %v296_v43 = vrot.slane %v294_v33, 2 }
 0x2ac   :  { %v214_v48 = vpop.permute.xlu1 %213 }
 0x2ad   :  { %v208_v49 = vpop.permute.xlu0 %207 }
 0x2ae   :  { %v210_v50 = vadd.f32 %v208_v49, %v204_v47 }
 0x2b0   :  { %v216_v51 = vadd.f32 %v214_v48, %v210_v50 }
 0x2b2   :  { %v217_v52 = vadd.f32 %v543_v44, %v216_v51 }
 0x2b4   :  { %v223_v56 = vadd.f32 %v221_v53, %v217_v52  ;;  %v233_v60 = vpop.permute.xlu1 %232 }
 0x2b5   :  { %v227_v57 = vpop.permute.xlu0 %226 }
 0x2b6   :  { %v229_v59 = vadd.f32 %v227_v57, %v223_v56  ;;  %v526_v56 = vld [vmem:[%s841_s6 + $0x1] ss:$0 sm:$0xff] }
 0x2b8   :  { %v235_v62 = vadd.f32 %v233_v60, %v229_v59 }
 0x2ba   :  { %544 = vrcp.f32 %v235_v62  ;;  %v247_v9 = vand.u32 2147483648, %v235_v62  ;;  %v245_v12 = vand.u32 2147483647, %v235_v62  ;;  %vm241_vm6 = vweird.f32 %v235_v62 }
 0x2bc   :  { %v248_v14 = vor.u32 1.1754944e-38, %v247_v9  ;;  %vm246_vm8 = vcmp.eq.f32.partialorder %v245_v12, 8.507059e+37  ;;  %v267_v19 = vpop.permute.xlu1 %266 }
 0x2bd   :  { %v253_v23 = vpop.permute.xlu0 %252  ;;  %v269_v29 = vmul.f32 %v267_v19, %v735_v5  ;;  %v428_v19 = vld [vmem:[%s840_s5 + $0x18] sm:$0xff]  ;;  %s666_s5 = smov [#allocation8]  }
 0x2be   :  { %v255_v30 = vmul.f32 %v253_v23, %v735_v5  ;;  %445 = vmatpush.msra.mxu1 %v428_v19  ;;  %s481_s20 = sshll.u32 %s666_s5, 4  ;;  %s482_s20 = int_to_ptr.vmem [resolvable:$true] %s481_s20 }
 0x2bf   :  { %v271_v37 = vrot.slane %v269_v29, 4 }
 0x2c0   :  { %v545_v4 = vpop.eup %544  ;;  %v264_v38 = vadd.f32 %v262_v31, %v255_v30  ;;  %446 = vmatpush.msra.mxu1 %v427_v20 }
 0x2c1   :  { %v237_v6 = vmul.f32 %v545_v4, %v235_v62  ;;  %vm242_vm5 = vweird.f32 %v545_v4 }
 0x2c2   :  { %vm243_vm7 = vmor %vm241_vm6, %vm242_vm5  ;;  %v273_v40 = vadd.f32 %v271_v37, %v264_v38  ;;  %447 = vmatpush.msra.mxu1 %v426_v21 }
 0x2c3   :  { %v238_v8 = vsub.f32 1.0, %v237_v6 }
 0x2c4   :  { %v282_v34 = vadd.f32 %v280_v27, %v273_v40  ;;  %448 = vmatpush.msra.mxu1 %v425_v22 }
 0x2c5   :  { %v239_v10 = vmul.f32 %v545_v4, %v238_v8  ;;  %v286_v32 = vpop.permute.xlu1 %285 }
 0x2c6   :  { %v288_v28 = vmul.f32 %v286_v32, %v741_v11  ;;  %v301_v35 = vpop.permute.xlu0 %300 }
 0x2c7   :  { %v240_v13 = vadd.f32 %v545_v4, %v239_v10  ;;  %v303_v44 = vmul.f32 %v301_v35, %v741_v11 }
 0x2c8   :  { %v289_v42 = vadd.f32 %v288_v28, %v282_v34 }
 0x2c9   :  { %v244_v15 = vsel %vm243_vm7, %v545_v4, %v240_v13  ;;  %v305_v47 = vrot.slane %v303_v44, 4 }
 0x2ca   :  { %v249_v16 = vsel %vm246_vm8, %v248_v14, %v244_v15  ;;  %v298_v46 = vadd.f32 %v296_v43, %v289_v42 }
 0x2cb   :  { %319 = vperm.xlu2 %523, %v249_v16  }
 0x2cc   :  { %v307_v5 = vadd.f32 %v305_v47, %v298_v46 }
 0x2ce   :  { %v310_v36 = vpop.permute.xlu1 %309 }
 0x2cf   :  { %v312_v45 = vmul.f32 %v310_v36, %v741_v11 }
 0x2d1   :  { %v314_v48 = vrot.slane %v312_v45, 6 }
 0x2d3   :  { %328 = vrot.lane.b32.xlu2 %v724_v0, %s664_s0  ;;  %v49_v0 = vld [vmem:[%s838_s3] sm:$0x3]  ;;  %v316_v50 = vadd.f32 %v314_v48, %v307_v5 }
 0x2d4   :  { %395 = vrot.lane.b32.xlu1 %v49_v0, %s660_s23 }
 0x2d6   :  { %v325_v52 = vpop.permute.xlu1 %324 }
 0x325   :  { %v320_v49 = vpop.permute.xlu2 %319 }
 0x326   :  { %v322_v51 = vmul.f32 %v320_v49, %v316_v50 }
 0x328   :  { %v332_v53 = vsel %vm331_vm9, %v322_v51, %v325_v52 }
 0x32d   :  { %v329_v54 = vpop.permute.xlu2 %328 }
 0x32e   :  { %v334_v55 = vsel %vm333_vm10, %v332_v53, %v329_v54 }
 0x32f   :  { %502 = vmatmul.msk.f32.vlgmr.msra.gmra.mxu0 %vm350_vm11, %v334_v55 }
 0x346   :  { %v396_v13 = vpop.permute.xlu1 %395 }
 0x3ac   :  { %v371_v11 = vpop.f32.mrf.mxu0 }
 0x3ad   :  { %v372_v57 = vadd.f32 %v526_v56, %v371_v11 }
 0x3af   :  { %546 = vtanh.f32 %v372_v57  ;;  %v503_v59 = vmul.f32 -1.442695, %v372_v57 }
 0x3b1   :  { %548 = vpow2.f32 %v503_v59 }
 0x3b5   :  { %v547_v58 = vpop.eup %546 }
 0x3b6   :  { %400 = vrot.lane.b32.xlu0 %v547_v58, %s663_s25 }
 0x3b7   :  { %v549_v60 = vpop.eup %548 }
 0x3b8   :  { %v377_v61 = vadd.f32 1.0, %v549_v60 }
 0x3ba   :  { %550 = vrcp.f32 %v377_v61  ;;  %v389_v4 = vand.u32 2147483648, %v377_v61  ;;  %vm383_vm13 = vweird.f32 %v377_v61  ;;  %v387_v6 = vand.u32 2147483647, %v377_v61 }
 0x3bc   :  { %v390_v8 = vor.u32 1.1754944e-38, %v389_v4  ;;  %vm388_vm15 = vcmp.eq.f32.partialorder %v387_v6, 8.507059e+37 }
 0x3c0   :  { %v551_v62 = vpop.eup %550 }
 0x3c1   :  { %v379_v63 = vmul.f32 %v551_v62, %v377_v61  ;;  %vm384_vm12 = vweird.f32 %v551_v62 }
 0x3c2   :  { %vm385_vm14 = vmor %vm383_vm13, %vm384_vm12 }
 0x3c3   :  { %v380_v1 = vsub.f32 1.0, %v379_v63 }
 0x3c5   :  { %v381_v2 = vmul.f32 %v551_v62, %v380_v1 }
 0x3c7   :  { %v382_v3 = vadd.f32 %v551_v62, %v381_v2 }
 0x3c9   :  { %v386_v7 = vsel %vm385_vm14, %v551_v62, %v382_v3 }
 0x3ca   :  { %v391_v9 = vsel %vm388_vm15, %v390_v8, %v386_v7 }
 0x3cb   :  { %v398_v14 = vmul.f32 %v396_v13, %v391_v9 }
 0x428   :  { %v401_v10 = vpop.permute.xlu0 %400 }
 0x429   :  { %v403_v12 = vmul.f32 %v401_v10, %v391_v9 }
 0x42b   :  { %405 = vrot.lane.b32.xlu2 %v403_v12, %s660_s23 }
 0x485   :  { %v406_v15 = vpop.permute.xlu2 %405 }
 0x486   :  { %v408_v16 = vadd.f32 %v406_v15, %v398_v14 }
 0x488   :  { %552 = vtanh.f32 %v408_v16  ;;  %416 = vrot.lane.b32.xlu2 %v408_v16, %s659_s4  ;;  %s472_s4 = sshll.u32 %s843_s8, 4  ;;  %s667_s8 = smov [#allocation5]   ;;  %s473_s4 = int_to_ptr.hbm [resolvable:$true] %s472_s4 }
 0x489   :  { %s459_s24 = sshll.u32 %s667_s8, 4  ;;  %s460_s24 = int_to_ptr.vmem [resolvable:$true] %s459_s24 }
 0x48e   :  { %v553_v17 = vpop.eup %552 }
 0x48f   :  { %411 = vrot.lane.b32.xlu0 %v553_v17, %s663_s25 }
 0x4e2   :  { %v417_v18 = vpop.permute.xlu2 %416 }
 0x4e3   :  { %419 = vst.msk [vmem:[#allocation8] sm:$0x3] %vm57_vm0, %v417_v18 }
 0x501   :  { %v412_v23 = vpop.permute.xlu0 %411 }
 0x502   :  { %v414_v24 = vmul.f32 %v412_v23, %v391_v9 }
 0x504   :  { %421 = vrot.lane.b32.xlu1 %v414_v24, %s660_s23 }
 0x576   :  { %v422_v25 = vpop.permute.xlu1 %421 }
 0x577   :  { %424 = vst.msk [vmem:[#allocation6] sm:$0x3] %vm57_vm0, %v422_v25  ;;  %504 = vmatmul.msk.f32.vlgmr.msra.gmra.mxu1 %vm430_vm1, %v422_v25 }
 0x578   :  { %475 = dma.vmem_to_hbm [thread:$0]  %s471_s17, 32, %s473_s4, [#allocation7]  }
 0x579   :  { %486 = dma.vmem_to_hbm [thread:$0]  %s482_s20, 32, %s484_s22, [#allocation7]  }
 0x5f4   :  { %v450_v29 = vpop.f32.mrf.mxu1 }
 0x5f5   :  { %v451_v30 = vadd.f32 %v527_v26, %v450_v29 }
 0x5f7   :  { %453 = vst.msk [vmem:[#allocation5] sm:$0x3] %vm57_vm0, %v451_v30 }
 0x5f8   :  { %464 = dma.vmem_to_hbm [thread:$0]  %s460_s24, 32, %s462_s26, [#allocation4]  }
 0x5f9   :  { %652 = dma.done.wait [#allocation4], 32  }
 0x5fa   :  { %653 = vsyncadd [#allocation4], 4294967264 }
 0x5fb   :  { %654 = dma.done.wait [#allocation7], 64  }
 0x5fc   :  { %655 = vsyncadd [#allocation7], 4294967232 }
 0x5fd   :  { %499 = vsyncpa [#allocation3], 1 }
 0x5fe   :  { %500 = vsyncpa [#allocation4], 1 }
 0x5ff   :  { %501 = vsyncpa [#allocation7], 1 }

</bundles_post_ra>
